<compile_context>
chip_gen: v7x
topology: tpu7x:2x2x1
jax: 0.10.0
libtpu: 0.0.40
codegen_flags: <defaults>
</compile_context>

<pallas_src>
import itertools

import numpy as np
import jax
import jax.numpy as jnp
from jax import lax
from jax.experimental import pallas as pl
from jax.experimental.pallas import tpu as pltpu


def _downsample_kernel(band_ref, halo_ref, w_ref, o_ref):
    """One (batch, row-band) tile of the folded 2x2 VALID conv.

    band_ref: (1, TH, Wp, K)  folded-input rows [r*TH, r*TH+TH)         (bf16)
    halo_ref: (1, 1,  Wp, K)  folded-input row   r*TH+TH  (1-row halo)  (bf16)
    w_ref:    (4, K, N)       folded weights, tap t = 2*u + v           (bf16)
    o_ref:    (1, TH, Wo, N)  output band, PixelUnshuffle channel order (bf16)
    """
    th = o_ref.shape[1]
    wo = o_ref.shape[2]
    f32 = jnp.float32

    def emit_row(y, row0, row1):
        # row0 / row1: folded rows y and y+1, each (Wp, K).
        # Tap (u, v): output pixel (y, x) reads folded input (y + u, x + v).
        # NOTE: the v=1 slices are sublane-offset-1 reads; acceptable here
        # because the kernel is HBM-bound (XLU slack covers the relayout).
        acc = jnp.dot(row0[0:wo, :], w_ref[0], preferred_element_type=f32)
        acc = acc + jnp.dot(row0[1:wo + 1, :], w_ref[1],
                            preferred_element_type=f32)
        acc = acc + jnp.dot(row1[0:wo, :], w_ref[2],
                            preferred_element_type=f32)
        acc = acc + jnp.dot(row1[1:wo + 1, :], w_ref[3],
                            preferred_element_type=f32)
        o_ref[0, y] = acc.astype(o_ref.dtype)

    # Rows 0 .. th-2: the "+1 row" tap comes from inside the band.
    def body(y, carry):
        emit_row(y, band_ref[0, y], band_ref[0, y + 1])
        return carry

    lax.fori_loop(0, th - 1, body, 0)

    # Last row of the band: the "+1 row" tap is the 1-row halo.
    emit_row(th - 1, band_ref[0, th - 1], halo_ref[0, 0])


def _fold_weights(w_oihw):
    """Fold OIHW 3x3 conv weights + PixelUnshuffle(2) into 2x2-conv weights.

    Returns wf of shape (4, 4*Cin, 4*Cout):
      tap index t = 2*u + v                 (folded row / col offset)
      K index     = (rp*2 + cp)*Cin + ci    (input row/col parity, channel)
      N index     = c*4 + ph*2 + pw         (PyTorch PixelUnshuffle order)
    """
    cout, cin, kh, kw = w_oihw.shape
    assert (kh, kw) == (3, 3)
    sel = np.zeros((2, 2, 2, 2, 2, 2, 3, 3), np.float32)
    for u, v, rp, cp, ph, pw in itertools.product(range(2), repeat=6):
        dy = 2 * u + rp - ph
        dx = 2 * v + cp - pw
        if 0 <= dy <= 2 and 0 <= dx <= 2:
            sel[u, v, rp, cp, ph, pw, dy, dx] = 1.0
    wf = jnp.einsum("uvrspqyx,oiyx->uvrsiopq",
                    jnp.asarray(sel), w_oihw.astype(jnp.float32))
    return wf.reshape(4, 4 * cin, 4 * cout)


def _tpu_vmem_capacity_bytes():
    """Physical per-core VMEM; falls back to the v7x value (64 MiB)."""
    try:
        info = pltpu.get_tpu_info()
        for name in ("vmem_capacity_bytes", "vmem_bytes", "vmem_size_bytes"):
            v = getattr(info, name, None)
            if v:
                return int(v)
    except Exception:
        pass
    return 64 << 20


def _pick_band_rows(h2, fits, max_th):
    """Band height: largest divisor of h2 that fits the VMEM budget.  If the
    divisors are degenerate (e.g. prime h2), pad h2 up to a band multiple
    instead of falling back to 1-row bands."""
    max_th = max(1, min(max_th, h2))
    while max_th > 1 and not fits(max_th):
        max_th -= 1
    best = 1
    for th in range(1, max_th + 1):
        if h2 % th == 0:
            best = th
    if best >= max(1, max_th // 2):
        return best, h2
    th = max_th
    return th, ((h2 + th - 1) // th) * th


def downsample_forward(x_nchw, weight_oihw):
    """Conv2d(C, C//2, 3, s=1, p=1, bias=False) + PixelUnshuffle(2).

    x_nchw:      (B, C, H, W)          float32, NCHW (PyTorch layout)
    weight_oihw: (C//2, C, 3, 3)       float32, PyTorch Conv2d weight layout
    returns:     (B, 2*C, H//2, W//2)  float32, NCHW (matches PyTorch)
    """
    b, c, h, w = x_nchw.shape
    assert h % 2 == 0 and w % 2 == 0, "PixelUnshuffle(2) requires even H, W"
    cout = weight_oihw.shape[0]
    h2, wo = h // 2, w // 2
    wp = wo + 1
    k, n = 4 * c, 4 * cout

    # ---- generation-aware VMEM budgeting --------------------------------
    vmem_cap = _tpu_vmem_capacity_bytes()
    if vmem_cap >= (96 << 20):          # v5e / v6e: 128 MiB physical VMEM
        vmem_limit = 64 << 20
        ws_budget = 48 << 20
    else:                               # v7x: 64 MiB per TensorCore
        vmem_limit = 48 << 20
        ws_budget = 32 << 20

    # Working set: bf16 weights (counted x2 pipeline buffers -- the index_map
    # is constant so one would suffice, keep the accounting conservative),
    # double-buffered bf16 band + halo, double-buffered bf16 output band and
    # slack for the per-row f32 accumulators.
    w_bytes = 2 * (4 * k * n * 2)

    def fits(th):
        in_bytes = 2 * ((th + 1) * wp * k * 2)
        out_bytes = 2 * (th * wo * n * 2)
        tmp_bytes = 8 * wo * n * 4
        return w_bytes + in_bytes + out_bytes + tmp_bytes <= ws_budget

    # Keep >= ~4 grid steps when batch is small so both v7x TCs stay busy.
    min_bands = max(1, 4 // max(b, 1))
    max_th = -(-h2 // min_bands)
    th, h2p = _pick_band_rows(h2, fits, max_th)
    n_bands = h2p // th
    extra = h2p - h2                    # zero folded rows appended at bottom
    hp = h2p + 1

    # ---- input fold: pad(1) + NCHW->NHWC + 2x2 space-to-depth + bf16 ----
    # XLA fuses this chain into one copy; it subsumes the NCHW->NHWC layout
    # change the MXU kernel needs anyway.
    # TODO(synk): if the surrounding model keeps activations NHWC/bf16 this
    # fold (an extra HBM pass) can be absorbed by the producer of `x`.
    xp = jnp.pad(x_nchw, ((0, 0), (0, 0), (1, 1 + 2 * extra), (1, 1)))
    xf = xp.reshape(b, c, hp, 2, wp, 2)
    xf = jnp.transpose(xf, (0, 2, 4, 3, 5, 1)).reshape(b, hp, wp, k)
    xf = xf.astype(jnp.bfloat16)

    wf = _fold_weights(weight_oihw).astype(jnp.bfloat16)

    y = pl.pallas_call(
        _downsample_kernel,
        out_shape=jax.ShapeDtypeStruct((b, h2p, wo, n), jnp.bfloat16),
        grid_spec=pltpu.PrefetchScalarGridSpec(
            num_scalar_prefetch=0,
            grid=(b, n_bands),
            in_specs=[
                # Row band [r*th, r*th+th) of the folded input.
                pl.BlockSpec((1, th, wp, k), lambda bi, r: (bi, r, 0, 0)),
                # 1-row halo (row r*th+th) -- second view of the same array.
                pl.BlockSpec((1, 1, wp, k),
                             lambda bi, r: (bi, r * th + th, 0, 0)),
                # Folded weights, resident across the whole grid.
                pl.BlockSpec((4, k, n), lambda bi, r: (0, 0, 0)),
            ],
            out_specs=pl.BlockSpec((1, th, wo, n),
                                   lambda bi, r: (bi, r, 0, 0)),
        ),
        compiler_params=pltpu.CompilerParams(
            dimension_semantics=("parallel", "parallel"),
            vmem_limit_bytes=vmem_limit,
        ),
    )(xf, xf, wf)

    # Drop pad rows (if any) and restore the PyTorch NCHW f32 interface.
    # Slice + transpose + f32 cast fuse into a single XLA copy.
    # TODO(synk): an NHWC consumer can take `y[:, :h2]` directly (channels are
    # already in PixelUnshuffle order) and skip this pass entirely.
    if extra:
        y = y[:, :h2]
    return jnp.transpose(y, (0, 3, 1, 2)).astype(jnp.float32)


def _pixel_unshuffle_nchw(x, r):
    """PyTorch nn.PixelUnshuffle semantics on NCHW input (reference only)."""
    b, c, h, w = x.shape
    x = x.reshape(b, c, h // r, r, w // r, r)
    x = x.transpose(0, 1, 3, 5, 2, 4)
    return x.reshape(b, c * r * r, h // r, w // r)


if __name__ == "__main__":
    B, n_feat, H, W = 2, 16, 16, 16
    key = jax.random.PRNGKey(0)
    kx, kw = jax.random.split(key)
    x = jax.random.normal(kx, (B, n_feat, H, W), dtype=jnp.float32)
    fan_in = n_feat * 3 * 3
    weight = jax.random.normal(
        kw, (n_feat // 2, n_feat, 3, 3), dtype=jnp.float32) * (fan_in ** -0.5)

    fwd = jax.jit(downsample_forward)
    out = jax.block_until_ready(fwd(x, weight))
    assert out.shape == (B, 2 * n_feat, H // 2, W // 2), out.shape

    # Reference: XLA conv (same semantics as torch Conv2d) + PixelUnshuffle.
    ref_conv = lax.conv_general_dilated(
        x, weight, window_strides=(1, 1), padding=((1, 1), (1, 1)),
        dimension_numbers=("NCHW", "OIHW", "NCHW"),
        precision=lax.Precision.HIGHEST)
    ref = _pixel_unshuffle_nchw(ref_conv, 2)
    # bf16 MXU operands + bf16 kernel store (f32 accumulation) vs f32 ref.
    max_err = float(jnp.max(jnp.abs(out - ref)))
    assert jnp.allclose(out, ref, atol=5e-2, rtol=5e-2), max_err
    print("KERNEL_OK")
</pallas_src>

<mosaic_0001>
module attributes {stable_mosaic.version = 11 : i64} {
  func.func @_downsample_kernel(%arg0: i32, %arg1: i32, %arg2: memref<1x4x9x64xbf16, #tpu.memory_space<vmem>>, %arg3: memref<1x1x9x64xbf16, #tpu.memory_space<vmem>>, %arg4: memref<4x64x32xbf16, #tpu.memory_space<vmem>>, %arg5: memref<1x4x8x32xbf16, #tpu.memory_space<vmem>>) attributes {dimension_semantics = [#tpu.dimension_semantics<parallel>, #tpu.dimension_semantics<parallel>], iteration_bounds = array<i64: 2, 2>, scalar_prefetch = 0 : i64, scratch_operands = 0 : i64, tpu.core_type = #tpu.core_type<tc>, window_params = [{transform_indices = @transform_0, window_bounds = array<i64: 1, 4, 9, 64>}, {transform_indices = @transform_1, window_bounds = array<i64: 1, 1, 9, 64>}, {pipeline_mode = #tpu.pipeline_mode<synchronous>, transform_indices = @transform_2, window_bounds = array<i64: 4, 64, 32>}, {transform_indices = @transform_3, window_bounds = array<i64: 1, 4, 8, 32>}]} {
    %c0_i32 = arith.constant 0 : i32
    %c3_i32 = arith.constant 3 : i32
    %0 = arith.addi %c0_i32, %c3_i32 : i32
    %c1_i32 = arith.constant 1 : i32
    scf.for %arg6 = %c0_i32 to %0 step %c1_i32  : i32 {
      %c0_24 = arith.constant 0 : index
      %28 = arith.index_cast %arg6 : i32 to index
      %c0_25 = arith.constant 0 : index
      %c0_26 = arith.constant 0 : index
      %29 = vector.load %arg2[%c0_24, %28, %c0_25, %c0_26] : memref<1x4x9x64xbf16, #tpu.memory_space<vmem>>, vector<1x1x9x64xbf16>
      %30 = vector.shape_cast %29 : vector<1x1x9x64xbf16> to vector<9x64xbf16>
      %c1_i32_27 = arith.constant 1 : i32
      %31 = arith.addi %arg6, %c1_i32_27 : i32
      %c0_28 = arith.constant 0 : index
      %32 = arith.index_cast %31 : i32 to index
      %c0_29 = arith.constant 0 : index
      %c0_30 = arith.constant 0 : index
      %33 = vector.load %arg2[%c0_28, %32, %c0_29, %c0_30] : memref<1x4x9x64xbf16, #tpu.memory_space<vmem>>, vector<1x1x9x64xbf16>
      %34 = vector.shape_cast %33 : vector<1x1x9x64xbf16> to vector<9x64xbf16>
      %35 = vector.extract_strided_slice %30 {offsets = [0, 0], sizes = [8, 64], strides = [1, 1]} : vector<9x64xbf16> to vector<8x64xbf16>
      %c0_31 = arith.constant 0 : index
      %c0_32 = arith.constant 0 : index
      %c0_33 = arith.constant 0 : index
      %36 = vector.load %arg4[%c0_31, %c0_32, %c0_33] : memref<4x64x32xbf16, #tpu.memory_space<vmem>>, vector<1x64x32xbf16>
      %37 = vector.shape_cast %36 : vector<1x64x32xbf16> to vector<64x32xbf16>
      %cst_34 = arith.constant dense<0.000000e+00> : vector<8x32xf32>
      %38 = tpu.matmul %35, %37, %cst_34 {dimension_numbers = #tpu.dot_dimension_numbers<[1], [0], [0], [1], [0, 0, 1, 1], [], []>} : vector<8x64xbf16>, vector<64x32xbf16>, vector<8x32xf32> -> vector<8x32xf32>
      %39 = vector.extract_strided_slice %30 {offsets = [1, 0], sizes = [8, 64], strides = [1, 1]} : vector<9x64xbf16> to vector<8x64xbf16>
      %c1_35 = arith.constant 1 : index
      %c0_36 = arith.constant 0 : index
      %c0_37 = arith.constant 0 : index
      %40 = vector.load %arg4[%c1_35, %c0_36, %c0_37] : memref<4x64x32xbf16, #tpu.memory_space<vmem>>, vector<1x64x32xbf16>
      %41 = vector.shape_cast %40 : vector<1x64x32xbf16> to vector<64x32xbf16>
      %cst_38 = arith.constant dense<0.000000e+00> : vector<8x32xf32>
      %42 = tpu.matmul %39, %41, %cst_38 {dimension_numbers = #tpu.dot_dimension_numbers<[1], [0], [0], [1], [0, 0, 1, 1], [], []>} : vector<8x64xbf16>, vector<64x32xbf16>, vector<8x32xf32> -> vector<8x32xf32>
      %43 = arith.addf %38, %42 : vector<8x32xf32>
      %44 = vector.extract_strided_slice %34 {offsets = [0, 0], sizes = [8, 64], strides = [1, 1]} : vector<9x64xbf16> to vector<8x64xbf16>
      %c2_39 = arith.constant 2 : index
      %c0_40 = arith.constant 0 : index
      %c0_41 = arith.constant 0 : index
      %45 = vector.load %arg4[%c2_39, %c0_40, %c0_41] : memref<4x64x32xbf16, #tpu.memory_space<vmem>>, vector<1x64x32xbf16>
      %46 = vector.shape_cast %45 : vector<1x64x32xbf16> to vector<64x32xbf16>
      %cst_42 = arith.constant dense<0.000000e+00> : vector<8x32xf32>
      %47 = tpu.matmul %44, %46, %cst_42 {dimension_numbers = #tpu.dot_dimension_numbers<[1], [0], [0], [1], [0, 0, 1, 1], [], []>} : vector<8x64xbf16>, vector<64x32xbf16>, vector<8x32xf32> -> vector<8x32xf32>
      %48 = arith.addf %43, %47 : vector<8x32xf32>
      %49 = vector.extract_strided_slice %34 {offsets = [1, 0], sizes = [8, 64], strides = [1, 1]} : vector<9x64xbf16> to vector<8x64xbf16>
      %c3_43 = arith.constant 3 : index
      %c0_44 = arith.constant 0 : index
      %c0_45 = arith.constant 0 : index
      %50 = vector.load %arg4[%c3_43, %c0_44, %c0_45] : memref<4x64x32xbf16, #tpu.memory_space<vmem>>, vector<1x64x32xbf16>
      %51 = vector.shape_cast %50 : vector<1x64x32xbf16> to vector<64x32xbf16>
      %cst_46 = arith.constant dense<0.000000e+00> : vector<8x32xf32>
      %52 = tpu.matmul %49, %51, %cst_46 {dimension_numbers = #tpu.dot_dimension_numbers<[1], [0], [0], [1], [0, 0, 1, 1], [], []>} : vector<8x64xbf16>, vector<64x32xbf16>, vector<8x32xf32> -> vector<8x32xf32>
      %53 = arith.addf %48, %52 : vector<8x32xf32>
      %54 = arith.truncf %53 : vector<8x32xf32> to vector<8x32xbf16>
      %c0_47 = arith.constant 0 : index
      %55 = arith.index_cast %arg6 : i32 to index
      %c0_48 = arith.constant 0 : index
      %c0_49 = arith.constant 0 : index
      %56 = vector.load %arg5[%c0_47, %55, %c0_48, %c0_49] : memref<1x4x8x32xbf16, #tpu.memory_space<vmem>>, vector<1x1x8x32xbf16>
      %57 = vector.shape_cast %56 : vector<1x1x8x32xbf16> to vector<8x32xbf16>
      %58 = vector.shape_cast %54 : vector<8x32xbf16> to vector<1x1x8x32xbf16>
      tpu.vector_store %arg5[%c0_47, %55, %c0_48, %c0_49], %58 {strides = array<i32>} : memref<1x4x8x32xbf16, #tpu.memory_space<vmem>>, vector<1x1x8x32xbf16>,
    }
    %c3_i32_0 = arith.constant 3 : i32
    %c0 = arith.constant 0 : index
    %c3 = arith.constant 3 : index
    %c0_1 = arith.constant 0 : index
    %c0_2 = arith.constant 0 : index
    %1 = vector.load %arg2[%c0, %c3, %c0_1, %c0_2] : memref<1x4x9x64xbf16, #tpu.memory_space<vmem>>, vector<1x1x9x64xbf16>
    %2 = vector.shape_cast %1 : vector<1x1x9x64xbf16> to vector<9x64xbf16>
    %c0_3 = arith.constant 0 : index
    %c0_4 = arith.constant 0 : index
    %c0_5 = arith.constant 0 : index
    %c0_6 = arith.constant 0 : index
    %3 = vector.load %arg3[%c0_3, %c0_4, %c0_5, %c0_6] : memref<1x1x9x64xbf16, #tpu.memory_space<vmem>>, vector<1x1x9x64xbf16>
    %4 = vector.shape_cast %3 : vector<1x1x9x64xbf16> to vector<9x64xbf16>
    %5 = vector.extract_strided_slice %2 {offsets = [0, 0], sizes = [8, 64], strides = [1, 1]} : vector<9x64xbf16> to vector<8x64xbf16>
    %c0_7 = arith.constant 0 : index
    %c0_8 = arith.constant 0 : index
    %c0_9 = arith.constant 0 : index
    %6 = vector.load %arg4[%c0_7, %c0_8, %c0_9] : memref<4x64x32xbf16, #tpu.memory_space<vmem>>, vector<1x64x32xbf16>
    %7 = vector.shape_cast %6 : vector<1x64x32xbf16> to vector<64x32xbf16>
    %cst = arith.constant dense<0.000000e+00> : vector<8x32xf32>
    %8 = tpu.matmul %5, %7, %cst {dimension_numbers = #tpu.dot_dimension_numbers<[1], [0], [0], [1], [0, 0, 1, 1], [], []>} : vector<8x64xbf16>, vector<64x32xbf16>, vector<8x32xf32> -> vector<8x32xf32>
    %9 = vector.extract_strided_slice %2 {offsets = [1, 0], sizes = [8, 64], strides = [1, 1]} : vector<9x64xbf16> to vector<8x64xbf16>
    %c1 = arith.constant 1 : index
    %c0_10 = arith.constant 0 : index
    %c0_11 = arith.constant 0 : index
    %10 = vector.load %arg4[%c1, %c0_10, %c0_11] : memref<4x64x32xbf16, #tpu.memory_space<vmem>>, vector<1x64x32xbf16>
    %11 = vector.shape_cast %10 : vector<1x64x32xbf16> to vector<64x32xbf16>
    %cst_12 = arith.constant dense<0.000000e+00> : vector<8x32xf32>
    %12 = tpu.matmul %9, %11, %cst_12 {dimension_numbers = #tpu.dot_dimension_numbers<[1], [0], [0], [1], [0, 0, 1, 1], [], []>} : vector<8x64xbf16>, vector<64x32xbf16>, vector<8x32xf32> -> vector<8x32xf32>
    %13 = arith.addf %8, %12 : vector<8x32xf32>
    %14 = vector.extract_strided_slice %4 {offsets = [0, 0], sizes = [8, 64], strides = [1, 1]} : vector<9x64xbf16> to vector<8x64xbf16>
    %c2 = arith.constant 2 : index
    %c0_13 = arith.constant 0 : index
    %c0_14 = arith.constant 0 : index
    %15 = vector.load %arg4[%c2, %c0_13, %c0_14] : memref<4x64x32xbf16, #tpu.memory_space<vmem>>, vector<1x64x32xbf16>
    %16 = vector.shape_cast %15 : vector<1x64x32xbf16> to vector<64x32xbf16>
    %cst_15 = arith.constant dense<0.000000e+00> : vector<8x32xf32>
    %17 = tpu.matmul %14, %16, %cst_15 {dimension_numbers = #tpu.dot_dimension_numbers<[1], [0], [0], [1], [0, 0, 1, 1], [], []>} : vector<8x64xbf16>, vector<64x32xbf16>, vector<8x32xf32> -> vector<8x32xf32>
    %18 = arith.addf %13, %17 : vector<8x32xf32>
    %19 = vector.extract_strided_slice %4 {offsets = [1, 0], sizes = [8, 64], strides = [1, 1]} : vector<9x64xbf16> to vector<8x64xbf16>
    %c3_16 = arith.constant 3 : index
    %c0_17 = arith.constant 0 : index
    %c0_18 = arith.constant 0 : index
    %20 = vector.load %arg4[%c3_16, %c0_17, %c0_18] : memref<4x64x32xbf16, #tpu.memory_space<vmem>>, vector<1x64x32xbf16>
    %21 = vector.shape_cast %20 : vector<1x64x32xbf16> to vector<64x32xbf16>
    %cst_19 = arith.constant dense<0.000000e+00> : vector<8x32xf32>
    %22 = tpu.matmul %19, %21, %cst_19 {dimension_numbers = #tpu.dot_dimension_numbers<[1], [0], [0], [1], [0, 0, 1, 1], [], []>} : vector<8x64xbf16>, vector<64x32xbf16>, vector<8x32xf32> -> vector<8x32xf32>
    %23 = arith.addf %18, %22 : vector<8x32xf32>
    %24 = arith.truncf %23 : vector<8x32xf32> to vector<8x32xbf16>
    %c0_20 = arith.constant 0 : index
    %c3_21 = arith.constant 3 : index
    %c0_22 = arith.constant 0 : index
    %c0_23 = arith.constant 0 : index
    %25 = vector.load %arg5[%c0_20, %c3_21, %c0_22, %c0_23] : memref<1x4x8x32xbf16, #tpu.memory_space<vmem>>, vector<1x1x8x32xbf16>
    %26 = vector.shape_cast %25 : vector<1x1x8x32xbf16> to vector<8x32xbf16>
    %27 = vector.shape_cast %24 : vector<8x32xbf16> to vector<1x1x8x32xbf16>
    tpu.vector_store %arg5[%c0_20, %c3_21, %c0_22, %c0_23], %27 {strides = array<i32>} : memref<1x4x8x32xbf16, #tpu.memory_space<vmem>>, vector<1x1x8x32xbf16>,
    return
  }
  func.func @transform_0(%arg0: i32, %arg1: i32) -> (i32, i32, i32, i32) {
    %c0_i32 = arith.constant 0 : i32
    %c0_i32_0 = arith.constant 0 : i32
    %c0_i32_1 = arith.constant 0 : i32
    return %arg0, %arg1, %c0_i32, %c0_i32_0 : i32, i32, i32, i32
  }
  func.func @transform_1(%arg0: i32, %arg1: i32) -> (i32, i32, i32, i32) {
    %c4_i32 = arith.constant 4 : i32
    %0 = arith.muli %arg1, %c4_i32 : i32
    %c4_i32_0 = arith.constant 4 : i32
    %1 = arith.addi %0, %c4_i32_0 : i32
    %c0_i32 = arith.constant 0 : i32
    %c0_i32_1 = arith.constant 0 : i32
    %c0_i32_2 = arith.constant 0 : i32
    return %arg0, %1, %c0_i32, %c0_i32_1 : i32, i32, i32, i32
  }
  func.func @transform_2(%arg0: i32, %arg1: i32) -> (i32, i32, i32) {
    %c0_i32 = arith.constant 0 : i32
    %c0_i32_0 = arith.constant 0 : i32
    %c0_i32_1 = arith.constant 0 : i32
    %c0_i32_2 = arith.constant 0 : i32
    return %c0_i32, %c0_i32_0, %c0_i32_1 : i32, i32, i32
  }
  func.func @transform_3(%arg0: i32, %arg1: i32) -> (i32, i32, i32, i32) {
    %c0_i32 = arith.constant 0 : i32
    %c0_i32_0 = arith.constant 0 : i32
    %c0_i32_1 = arith.constant 0 : i32
    return %arg0, %arg1, %c0_i32, %c0_i32_0 : i32, i32, i32, i32
  }
}

</mosaic_0001>

<bundles_post_ra>
// kernel: downsample_forward.1
= control target key start
LH: loop header
LB: loop body
LE: loop exit
PB: predicated region body
PF: predicated region fallthrough
CT: control target
= control target key end

     0   :  { %s1539_s12 = smov 0   ;;  %s1541_s13 = smov 0   ;;  %s1770_s0 = inlined_call_operand.vmem [shape: bf16[2,9,9,64], index: 0, kind: input, shape index: {}, may-alias: {0,1}]   ;;  %s1771_s1 = inlined_call_operand.vmem [shape: bf16[2,9,9,64], index: 1, kind: input, shape index: {}, may-alias: {0,1}]   ;;  %s1772_s2 = inlined_call_operand.vmem [shape: bf16[4,64,32], index: 2, kind: input, shape index: {}]   ;;  %s1773_s3 = inlined_call_operand.vmem [shape: bf16[2,8,8,32], index: 3, kind: output, shape index: {}]  }
   0x1   :  { %s1543_s14 = smov 0   ;;  %s1545_s15 = smov 0  }
   0x2   :  { %s1547_s16 = smov 0  }
   0x3 LB: > { %s22_s17 = sadd.s32 1, %s1501_s14  ;;  %s25_s18 = sadd.s32 1, %s1505_s15  ;;  %s1509_s16 = sphi %s1547_s16, %s13_s16   ;;  %s1505_s15 = sphi %s1545_s15, %s1777_s15   ;;  %s1501_s14 = sphi %s1543_s14, %s1776_s14   ;;  %s1497_s13 = sphi %s1541_s13, %s1775_s13   ;;  %s1493_s12 = sphi %s1539_s12, %s1774_s12  }
   0x4   : > { %p23_p0 = scmp.ge.s32.totalorder %s22_s17, 2  ;;  %p1110_p1 = scmp.ge.s32.totalorder %s1509_s16, 1 }
   0x5   : > { %p193_p2 = scmp.lt.s32.totalorder %s1509_s16, 5 }
   0x6   : > { %s1779_s17 = smov (%p23_p0, %s22_s17), 0  ;;  %s1781_s18 = smov (!%p23_p0, %s25_s18), %s1505_s15 }
   0x7   : > { %p194_p3 = pnand %p1110_p1, %p193_p2  ;;  %p27_p4 = scmp.ge.s32.totalorder %s1781_s18, 2 }
   0x8   : > { %s1111_s19 = sshll.u32 (!%p194_p3), %s1493_s12, 2  ;;  %p248_p5 = scmp.lt.s32.totalorder (!%p194_p3), %s1497_s13, 1 }
   0x9   : > { %s1783_s18 = smov (%p27_p4, %s1781_s18), 0  ;;  %197 = sbr.rel (%p194_p3) target bundleno = 507 (0x1fb), region = 32 }
   0xa   : > { %p250_p6 = scmp.lt.s32.totalorder (!%p194_p3), %s1111_s19, 8  ;;  %s264_s20 = sadd.s32 (!%p194_p3), 4, %s1111_s19 }
   0xb   : > { %p267_p7 = scmp.lt.s32.totalorder (!%p194_p3), %s264_s20, 8  ;;  %p279_p8 = scmp.lt.s32.totalorder (!%p194_p3), %s1111_s19, 7 }
  0x10   : > { %s1785_s13 = smov (!%p248_p5, %s1497_s13), 1  ;;  %s1787_s20 = smov (!%p267_p7, %s264_s20), 8 }
  0x11   : > { %s251_s21 = scalar_select %p250_p6, %s1111_s19, 8 }
  0x12   : > { %s1378_s22 = smul.u32 18, %s1785_s13  ;;  %s1118_s29 = sshll.u32 %s1785_s13, 3 }
  0x13   : > { %s1112_s23 = sshll.u32 %s251_s21, 1  ;;  %s1789_s19 = smov (!%p279_p8, %s1111_s19), 7 }
  0x14   : > { %s254_s24 = sadd.s32 %s1378_s22, %s1112_s23  ;;  %s1115_s30 = sshll.u32 %s1787_s20, 1 }
  0x15   : > { %s1113_s25 = sshll.u32 %s254_s24, 2  ;;  %s271_s4 = sadd.s32 %s1378_s22, %s1115_s30 }
  0x16   : > { %s1572_s28 = scalar_lea.vmem %s1770_s0, %s1113_s25  ;;  %s282_s5 = sadd.s32 %s1118_s29, %s1789_s19 }
  0x17   : > { %s1116_s6 = sshll.u32 %s271_s4, 2  ;;  %s1119_s7 = sshll.u32 %s282_s5, 2 }
  0x18   : > { %s1577_s10 = scalar_lea.vmem %s1771_s1, %s1116_s6  ;;  %s1582_s21 = scalar_lea.vmem %s1773_s3, %s1119_s7 }
  0x19   : > { %s1584_s23 = smov 0  }
  0x1a LB: >> { %v1431_v0 = vld [vmem:[%s1772_s2 + $0x20] sm:$0xff]   ;;  %v1515_v1 = vmov 0.0   ;;  %v1433_v3 = vld [vmem:[%s1772_s2 + $0x28] sm:$0xff]   ;;  %vm1516_vm0 = vmmov 0   ;;  %s1223_s26 = sshll.u32 %s1513_s23, 3  ;;  %v1435_v5 = vld [vmem:[%s1772_s2 + $0x30] sm:$0xff]   ;;  %s1513_s23 = sphi %s1584_s23, %s292_s23  }
  0x1b   : >> { %1264 = vmatprep.subr.bf16.mxu1 %v1515_v1  ;;  %1288 = vmatprep.subr.bf16.mxu0 %v1515_v1  ;;  %v1432_v2 = vld [vmem:[%s1772_s2 + $0x40] sm:$0xff]   ;;  %v1434_v4 = vld [vmem:[%s1772_s2 + $0x48] sm:$0xff]   ;;  %s295_s30 = scalar_lea.vmem %s1572_s28, %s1223_s26  ;;  %v1436_v6 = vld [vmem:[%s1772_s2 + $0x50] sm:$0xff]   ;;  %vm357_vm1 = vcmask 523264   ;;  %s1171_s11 = sshll.u32 %s1513_s23, 2  ;;  %vm637_vm2 = vcmask 257024  }
  0x1c   : >> { %1265 = vmatpush3.bf16.msra.mxu1 %v1431_v0  ;;  %1272 = vmatprep.mubr.msk.bf16.mxu1 %vm1516_vm0, %v1515_v1  ;;  %v296_v7 = vld [vmem:[%s295_s30] sm:$0xf]  ;;  %v297_v8 = vld [vmem:[%s295_s30 + $0x4] sm:$0x1]  ;;  %v1437_v10 = vld [vmem:[%s1772_s2 + $0x38] sm:$0xff]   ;;  %s636_s12 = scalar_lea.vmem %s1582_s21, %s1171_s11  ;;  %s292_s23 = sadd.s32 1, %s1513_s23  }
  0x1d   : >> { %1289 = vmatpush3.bf16.msra.mxu0 %v1432_v2  ;;  %1266 = vmatprep.subr.bf16.mxu1 %v1515_v1  ;;  %v1133_v9 = vcombine.low %v296_v7, %v297_v8  ;;  %v1438_v11 = vld [vmem:[%s1772_s2 + $0x58] sm:$0xff]   ;;  %v1440_v15 = vld [vmem:[%s1772_s2] sm:$0xff]   ;;  %v1123_v16 = vld [vmem:[%s295_s30 + $0x8] sm:$0xf]  ;;  %p289_p9 = scmp.ge.s32.totalorder %s292_s23, 3  }
  0x1e   : >> { %1290 = vmatprep.subr.bf16.mxu0 %v1515_v1  ;;  %1296 = vmatprep.mubr.msk.bf16.mxu0 %vm1516_vm0, %v1515_v1  ;;  %v1124_v17 = vld [vmem:[%s295_s30 + $0xc] sm:$0x1]  ;;  %v1442_v19 = vld [vmem:[%s1772_s2 + $0x60] sm:$0xff]   ;;  %v1445_v24 = vld [vmem:[%s1772_s2 + $0x10] sm:$0xff]   ;;  %v1517_v42 = vmov (%p289_p9), 0.0   ;;  %vm1518_vm3 = vmmov (%p289_p9), 0  }
  0x1f   : >> { %v327_v12 = vshrl.u32 %v1133_v9, 16  ;;  %v329_v13 = vshll.u32 %v1133_v9, 16  ;;  %v1165_v20 = vcombine.low %v1123_v16, %v1124_v17  ;;  %v1443_v21 = vld [vmem:[%s1772_s2 + $0x8] sm:$0xff]   ;;  %v1446_v25 = vld [vmem:[%s1772_s2 + $0x70] sm:$0xff]   ;;  %v1447_v28 = vld [vmem:[%s1772_s2 + $0x18] sm:$0xff]  }
  0x20   : >> { %1267 = vmatpush3.bf16.msra.mxu1 %v1433_v3  ;;  %v1444_v22 = vld [vmem:[%s1772_s2 + $0x68] sm:$0xff]   ;;  %v1448_v29 = vld [vmem:[%s1772_s2 + $0x78] sm:$0xff]   ;;  %v1449_v41 = vld [vmem:[%s1772_s2 + $0x20] sm:$0xff] (%p289_p9)  }
  0x21   : >> { %1291 = vmatpush3.bf16.msra.mxu0 %v1434_v4  ;;  %1268 = vmatprep.subr.bf16.mxu1 %v1515_v1  ;;  %v331_v14 = vrot.slane %v329_v13, 1  ;;  %v562_v23 = vshll.u32 %v1165_v20, 16  ;;  %v560_v26 = vshrl.u32 %v1165_v20, 16  ;;  %v1450_v43 = vld [vmem:[%s1772_s2 + $0x40] sm:$0xff] (%p289_p9)   ;;  %v1451_v44 = vld [vmem:[%s1772_s2 + $0x28] sm:$0xff] (%p289_p9)   ;;  %v1453_v46 = vld [vmem:[%s1772_s2 + $0x30] sm:$0xff] (%p289_p9)  }
  0x22   : >> { %1292 = vmatprep.subr.bf16.mxu0 %v1515_v1  ;;  %v1452_v45 = vld [vmem:[%s1772_s2 + $0x48] sm:$0xff] (%p289_p9)   ;;  %v1454_v47 = vld [vmem:[%s1772_s2 + $0x50] sm:$0xff] (%p289_p9)   ;;  %v1172_v48 = vld [vmem:[%s1572_s28 + $0x18] sm:$0xf] (%p289_p9) }
  0x23   : >> { %v332_v18 = vor.u32 %v331_v14, %v327_v12  ;;  %v564_v27 = vrot.slane %v562_v23, 1  ;;  %v1173_v49 = vld [vmem:[%s1572_s28 + $0x1c] sm:$0x1] (%p289_p9)  ;;  %v1458_v56 = vld [vmem:[%s1772_s2] sm:$0xff] (%p289_p9)   ;;  %v1461_v62 = vld [vmem:[%s1772_s2 + $0x8] sm:$0xff] (%p289_p9)  }
  0x24   : >> { %1269 = vmatpush3.bf16.msra.mxu1 %v1435_v5  ;;  %v1182_v50 = vcombine.low (%p289_p9), %v1172_v48, %v1173_v49  ;;  %v1455_v51 = vld [vmem:[%s1772_s2 + $0x38] sm:$0xff] (%p289_p9)   ;;  %v642_v57 = vld [vmem:[%s1577_s10] sm:$0xf] (%p289_p9)  ;;  %v643_v58 = vld [vmem:[%s1577_s10 + $0x4] sm:$0x1] (%p289_p9) }
  0x25   : >> { %1293 = vmatpush3.bf16.msra.mxu0 %v1436_v6  ;;  %1270 = vmatprep.subr.bf16.mxu1 %v1515_v1  ;;  %v565_v30 = vor.u32 %v564_v27, %v560_v26  ;;  %v1456_v52 = vld [vmem:[%s1772_s2 + $0x58] sm:$0xff] (%p289_p9)   ;;  %v1460_v60 = vld [vmem:[%s1772_s2 + $0x60] sm:$0xff] (%p289_p9)   ;;  %v1214_v61 = vcombine.low (%p289_p9), %v642_v57, %v643_v58  ;;  %v1462_v63 = vld [vmem:[%s1772_s2 + $0x68] sm:$0xff] (%p289_p9)  }
  0x26   : >> { %1294 = vmatprep.subr.bf16.mxu0 %v1515_v1  ;;  %v667_v53 = vshrl.u32 (%p289_p9), %v1182_v50, 16  ;;  %v669_v54 = vshll.u32 (%p289_p9), %v1182_v50, 16  ;;  %v1464_v2 = vld [vmem:[%s1772_s2 + $0x70] sm:$0xff] (%p289_p9)   ;;  %v1465_v5 = vld [vmem:[%s1772_s2 + $0x18] sm:$0xff] (%p289_p9)  }
  0x27   : > { %v902_v0 = vshll.u32 (%p289_p9), %v1214_v61, 16  ;;  %v900_v3 = vshrl.u32 (%p289_p9), %v1214_v61, 16  ;;  %v1466_v6 = vld [vmem:[%s1772_s2 + $0x78] sm:$0xff] (%p289_p9)  }
  0x28   : >> { %1271 = vmatpush3.bf16.msra.mxu1 %v1437_v10  ;;  %v671_v55 = vrot.slane (%p289_p9), %v669_v54, 1 }
  0x29   : >> { %1295 = vmatpush3.bf16.msra.mxu0 %v1438_v11  ;;  %1276 = vmatprep.subr.bf16.mxu1 %v1515_v1  ;;  %v904_v4 = vrot.slane (%p289_p9), %v902_v0, 1 }
  0x2a   : >> { %1300 = vmatprep.subr.bf16.mxu0 %v1515_v1  ;;  %v672_v59 = vor.u32 (%p289_p9), %v671_v55, %v667_v53 }
  0x2b   : >> { %1273 = vmatmul.mubr.msk.bf16.vlgmr.msra.gmra.mrb[0].mxu1 %vm357_vm1, %v332_v18 }
  0x2c   : >> { %1277 = vmatpush3.bf16.msra.mxu1 %v1440_v15  ;;  %1297 = vmatmul.mubr.msk.bf16.vlgmr.msra.gmra.mrb[0].mxu0 %vm357_vm1, %v1123_v16 }
  0x2d   : >> { %1301 = vmatpush3.bf16.msra.mxu0 %v1442_v19  ;;  %1278 = vmatprep.subr.bf16.mxu1 %v1515_v1 }
  0x2e   : >> { %1302 = vmatprep.subr.bf16.mxu0 %v1515_v1  ;;  %1284 = vmatprep.mubr.msk.bf16.mxu1 %vm1516_vm0, %v1515_v1 }
  0x2f   : >> { %1308 = vmatprep.mubr.msk.bf16.mxu0 %vm1516_vm0, %v1515_v1 }
  0x30   : >> { %1279 = vmatpush3.bf16.msra.mxu1 %v1443_v21 }
  0x31   : >> { %1303 = vmatpush3.bf16.msra.mxu0 %v1444_v22  ;;  %1280 = vmatprep.subr.bf16.mxu1 %v1515_v1 }
  0x32   : >> { %1304 = vmatprep.subr.bf16.mxu0 %v1515_v1 }
  0x34   : >> { %1281 = vmatpush3.bf16.msra.mxu1 %v1445_v24 }
  0x35   : >> { %1305 = vmatpush3.bf16.msra.mxu0 %v1446_v25  ;;  %1282 = vmatprep.subr.bf16.mxu1 %v1515_v1 }
  0x36   : >> { %1306 = vmatprep.subr.bf16.mxu0 %v1515_v1  ;;  %v1463_v1 = vld [vmem:[%s1772_s2 + $0x10] sm:$0xff] (%p289_p9)  }
  0x38   : >> { %1283 = vmatpush3.bf16.msra.mxu1 %v1447_v28 }
  0x39   : >> { %1307 = vmatpush3.bf16.msra.mxu0 %v1448_v29  ;;  %1312 = vmatprep.subr.bf16.mxu1 (%p289_p9), %v1517_v42 }
  0x3a   : > { %1336 = vmatprep.subr.bf16.mxu0 (%p289_p9), %v1517_v42 }
  0x3b   : >> { %1285 = vmatmul.mubr.msk.bf16.vlgmr.msra.gmra.mrb[0].mxu1 %vm357_vm1, %v296_v7  ;;  %v905_v7 = vor.u32 (%p289_p9), %v904_v4, %v900_v3 }
  0x3c   : >> { %1309 = vmatmul.mubr.msk.bf16.vlgmr.msra.gmra.mrb[0].mxu0 %vm357_vm1, %v565_v30  ;;  %1313 = vmatpush3.bf16.msra.mxu1 (%p289_p9), %v1449_v41 }
  0x3d   : > { %1320 = vmatprep.mubr.msk.bf16.mxu1 (%p289_p9), %vm1518_vm3, %v1517_v42  ;;  %1337 = vmatpush3.bf16.msra.mxu0 (%p289_p9), %v1450_v43 }
  0x3e   : > { %1314 = vmatprep.subr.bf16.mxu1 (%p289_p9), %v1517_v42  ;;  %1338 = vmatprep.subr.bf16.mxu0 (%p289_p9), %v1517_v42 }
  0x3f   : > { %1344 = vmatprep.mubr.msk.bf16.mxu0 (%p289_p9), %vm1518_vm3, %v1517_v42 }
  0x40   : > { %1315 = vmatpush3.bf16.msra.mxu1 (%p289_p9), %v1451_v44 }
  0x41   : > { %1339 = vmatpush3.bf16.msra.mxu0 (%p289_p9), %v1452_v45  ;;  %1316 = vmatprep.subr.bf16.mxu1 (%p289_p9), %v1517_v42 }
  0x42   : > { %1340 = vmatprep.subr.bf16.mxu0 (%p289_p9), %v1517_v42 }
  0x44   : > { %1317 = vmatpush3.bf16.msra.mxu1 (%p289_p9), %v1453_v46 }
  0x45   : > { %1341 = vmatpush3.bf16.msra.mxu0 (%p289_p9), %v1454_v47  ;;  %1318 = vmatprep.subr.bf16.mxu1 (%p289_p9), %v1517_v42 }
  0x46   : > { %1342 = vmatprep.subr.bf16.mxu0 (%p289_p9), %v1517_v42 }
  0x48   : > { %1319 = vmatpush3.bf16.msra.mxu1 (%p289_p9), %v1455_v51 }
  0x49   : > { %1343 = vmatpush3.bf16.msra.mxu0 (%p289_p9), %v1456_v52  ;;  %1324 = vmatprep.subr.bf16.mxu1 (%p289_p9), %v1517_v42 }
  0x4a   : > { %1348 = vmatprep.subr.bf16.mxu0 (%p289_p9), %v1517_v42 }
 0x10e   : >> { %v462_v31 = vpop.f32.mrb[0].mxu1  ;;  %291 = sbr.rel (!%p289_p9) target bundleno = 26 (0x1a), region = 83 }
 0x10f   : >> { %v627_v32 = vpop.f32.mrb[0].mxu0  ;;  %v1286_v33 = vpop.f32.mrb[1].mxu1 }
 0x110   : >> { %v1360_v34 = vadd.f32 %v627_v32, %v462_v31  ;;  %v1310_v35 = vpop.f32.mrb[1].mxu0  ;;  %v465_v36 = vpop.f32.mrb[2].mxu1 }
 0x111   : >> { %v630_v37 = vpop.f32.mrb[2].mxu0  ;;  %v1287_v38 = vpop.f32.mrb[3].mxu1  ;;  %1321 = vmatmul.mubr.msk.bf16.vlgmr.msra.gmra.mrb[0].mxu1 (%p289_p9), %vm357_vm1, %v672_v59 }
 0x112   : >> { %v634_v39 = vpack.c.bf16 %v1360_v34, %v1360_v34  ;;  %v1311_v40 = vpop.f32.mrb[3].mxu0  ;;  %1325 = vmatpush3.bf16.msra.mxu1 (%p289_p9), %v1458_v56  ;;  %1345 = vmatmul.mubr.msk.bf16.vlgmr.msra.gmra.mrb[0].mxu0 (%p289_p9), %vm357_vm1, %v642_v57 }
 0x113   : > { %1349 = vmatpush3.bf16.msra.mxu0 (%p289_p9), %v1460_v60  ;;  %1326 = vmatprep.subr.bf16.mxu1 (%p289_p9), %v1517_v42 }
 0x114   : >> { %638 = vst.msk [vmem:[%s636_s12] sm:$0xf] %vm637_vm2, %v634_v39  ;;  %1350 = vmatprep.subr.bf16.mxu0 (%p289_p9), %v1517_v42  ;;  %1332 = vmatprep.mubr.msk.bf16.mxu1 (%p289_p9), %vm1518_vm3, %v1517_v42 }
 0x115   : > { %1356 = vmatprep.mubr.msk.bf16.mxu0 %vm1518_vm3, %v1517_v42 }
 0x116   : > { %1327 = vmatpush3.bf16.msra.mxu1 %v1461_v62 }
 0x117   : > { %1351 = vmatpush3.bf16.msra.mxu0 %v1462_v63  ;;  %1328 = vmatprep.subr.bf16.mxu1 %v1517_v42 }
 0x118   : > { %1352 = vmatprep.subr.bf16.mxu0 %v1517_v42 }
 0x11a   : > { %1329 = vmatpush3.bf16.msra.mxu1 %v1463_v1 }
 0x11b   : > { %1353 = vmatpush3.bf16.msra.mxu0 %v1464_v2  ;;  %1330 = vmatprep.subr.bf16.mxu1 %v1517_v42 }
 0x11c   : > { %1354 = vmatprep.subr.bf16.mxu0 %v1517_v42 }
 0x11e   : > { %1331 = vmatpush3.bf16.msra.mxu1 %v1465_v5 }
 0x11f   : > { %1355 = vmatpush3.bf16.msra.mxu0 %v1466_v6 }
 0x121   : > { %1333 = vmatmul.mubr.msk.bf16.vlgmr.msra.gmra.mrb[0].mxu1 %vm357_vm1, %v1172_v48 }
 0x122   : > { %1357 = vmatmul.mubr.msk.bf16.vlgmr.msra.gmra.mrb[0].mxu0 %vm357_vm1, %v905_v7 }
 0x1f4   : > { %v802_v8 = vpop.f32.mrb[0].mxu1 }
 0x1f5   : > { %v967_v9 = vpop.f32.mrb[0].mxu0  ;;  %v1334_v10 = vpop.f32.mrb[1].mxu1 }
 0x1f6   : > { %v1369_v11 = vadd.f32 %v967_v9, %v802_v8  ;;  %v1358_v12 = vpop.f32.mrb[1].mxu0  ;;  %v805_v13 = vpop.f32.mrb[2].mxu1 }
 0x1f7   : > { %v970_v14 = vpop.f32.mrb[2].mxu0  ;;  %v1335_v15 = vpop.f32.mrb[3].mxu1 }
 0x1f8   : > { %v974_v16 = vpack.c.bf16 %v1369_v11, %v1369_v11  ;;  %v1359_v17 = vpop.f32.mrb[3].mxu0 }
 0x1fa   : > { %1220 = vst.msk [vmem:[%s1582_s21 + $0xc] sm:$0xf] %vm637_vm2, %v974_v16 }
 0x1fb PF: > { %s13_s16 = sadd.s32 1, %s1509_s16   ;;  %s1774_s12 = smov %s1501_s14 }
 0x1fc   : > { %p10_p10 = scmp.ge.s32.totalorder %s13_s16, 6   ;;  %s1775_s13 = smov %s1505_s15 }
 0x1fd   : > { %s1776_s14 = smov %s1779_s17  ;;  %s1777_s15 = smov %s1783_s18 }
 0x1fe   :  { %12 = sbr.rel (!%p10_p10) target bundleno = 3 (0x3), region = 94 }

</bundles_post_ra>
